<compile_context>
chip_gen: v7x
topology: tpu7x:2x2x1
jax: 0.10.0
libtpu: 0.0.40
codegen_flags: <defaults>
</compile_context>

<pallas_src>
import functools

import jax
import jax.numpy as jnp
from jax import lax
from jax.experimental import pallas as pl
from jax.experimental.pallas import tpu as pltpu

LANE = 128            # TPU lane width (minor vreg dim)
SUBLANE = 8           # f32 sublane tile
MAX_BATCH_TILE = 128  # rows per grid step: fills the MXU edge on all gens and
                      # keeps double-buffered tiles tiny vs v7x's 64 MiB VMEM


def _round_up(x, m):
    return ((x + m - 1) // m) * m


def lstm_kernel(tok_ref, emb_ref, wh_ref, wph_ref, bp_ref, out_ref):
    """Full LSTM recurrence for one batch tile.

    tok_ref : (S, TB, 1) int32  token ids for this batch tile
    emb_ref : (Vp, 4H)   f32    embedding @ W_x_fused + b_fused (vocab-padded)
    wh_ref  : (H, 4H)    f32    fused recurrent weights [g|i|f|o]
    wph_ref : (H, Cp)    f32    output projection, class-padded to lane width
    bp_ref  : (1, Cp)    f32    output bias (-1e30 in padded class lanes)
    out_ref : (TB, Cp)   f32    log-probabilities (lane-dense store)
    """
    S, TB, _ = tok_ref.shape
    H = wh_ref.shape[0]
    Vp = emb_ref.shape[0]

    emb = emb_ref[...]   # (Vp, 4H) resident for the whole tile
    wh = wh_ref[...]     # (H, 4H)

    h0 = jnp.zeros((TB, H), jnp.float32)
    c0 = jnp.zeros((TB, H), jnp.float32)

    def step(t, carry):
        h, c = carry
        # x-path: gather the precomputed projection row per token as a one-hot
        # MXU matmul; depends only on tokens, so it overlaps the h-chain.
        tok_t = tok_ref[t]                                            # (TB, 1)
        onehot = (tok_t == lax.broadcasted_iota(jnp.int32, (TB, Vp), 1)
                  ).astype(jnp.float32)                               # (TB, Vp)
        xproj_t = jnp.dot(onehot, emb, preferred_element_type=jnp.float32)
        # Serial critical path: ONE fused (TB,H)@(H,4H) MXU matmul per step.
        gates = xproj_t + jnp.dot(h, wh, preferred_element_type=jnp.float32)
        if TB <= SUBLANE:
            # Tiny-batch latency regime: two full-width EUP passes + static
            # slices (3 EUP pushes/step) instead of four masked narrow passes.
            sig = jax.nn.sigmoid(gates)
            tnh = jnp.tanh(gates)
            g_t = tnh[:, 0 * H:1 * H]
            i_t = sig[:, 1 * H:2 * H]
            f_t = sig[:, 2 * H:3 * H]
            o_t = sig[:, 3 * H:4 * H]
        else:
            # Throughput regime (EUP-bound): only push the needed elements.
            g_t = jnp.tanh(gates[:, 0 * H:1 * H])
            i_t = jax.nn.sigmoid(gates[:, 1 * H:2 * H])
            f_t = jax.nn.sigmoid(gates[:, 2 * H:3 * H])
            o_t = jax.nn.sigmoid(gates[:, 3 * H:4 * H])
        c_new = g_t * i_t + c * f_t
        h_new = jnp.tanh(c_new) * o_t
        return (h_new, c_new)

    # Full unroll only while S is small; partial unroll otherwise to keep vreg
    # live ranges bounded (64 vregs) while preserving MXU/EUP overlap.
    unroll = S if S <= 16 else 8
    h_t, _ = lax.fori_loop(0, S, step, (h0, c0), unroll=unroll)

    # Output projection + numerically stable log_softmax over the class axis.
    # Padded class lanes carry bias -1e30 -> exp underflows to 0, so they do
    # not perturb the log-sum-exp; the wrapper slices them away.
    y = jnp.dot(h_t, wph_ref[...], preferred_element_type=jnp.float32) + bp_ref[...]
    y_max = jnp.max(y, axis=-1, keepdims=True)
    y_shift = y - y_max
    lse = jnp.log(jnp.sum(jnp.exp(y_shift), axis=-1, keepdims=True))
    out_ref[...] = y_shift - lse


def init_params(key, input_dim, hidden_dim, num_classes):
    """Parameters in the PyTorch module's native layout (W: (out, in))."""
    ks = jax.random.split(key, 15)

    def kaiming(k, out_f, in_f):
        # nn.init.kaiming_normal_ default: std = sqrt(2 / fan_in)
        return jax.random.normal(k, (out_f, in_f), jnp.float32) * jnp.sqrt(2.0 / in_f)

    # NOTE: the module zero-inits biases; small random biases here so the
    # correctness check actually exercises the bias-folding path.
    return dict(
        embedding=jax.random.normal(ks[0], (input_dim, input_dim), jnp.float32),
        W_gx=kaiming(ks[1], hidden_dim, input_dim),
        W_gh=kaiming(ks[2], hidden_dim, hidden_dim),
        W_ix=kaiming(ks[3], hidden_dim, input_dim),
        W_ih=kaiming(ks[4], hidden_dim, hidden_dim),
        W_fx=kaiming(ks[5], hidden_dim, input_dim),
        W_fh=kaiming(ks[6], hidden_dim, hidden_dim),
        W_ox=kaiming(ks[7], hidden_dim, input_dim),
        W_oh=kaiming(ks[8], hidden_dim, hidden_dim),
        W_ph=kaiming(ks[9], num_classes, hidden_dim),
        b_g=0.1 * jax.random.normal(ks[10], (hidden_dim,), jnp.float32),
        b_i=0.1 * jax.random.normal(ks[11], (hidden_dim,), jnp.float32),
        b_f=0.1 * jax.random.normal(ks[12], (hidden_dim,), jnp.float32),
        b_o=0.1 * jax.random.normal(ks[13], (hidden_dim,), jnp.float32),
        b_p=0.1 * jax.random.normal(ks[14], (num_classes,), jnp.float32),
    )


def fuse_params(params):
    """Pre-transpose / pre-fuse weights ONCE (outside the jitted forward).

    Folds the embedding table through the fused input projection so the kernel
    never sees the x-path matmuls:  emb_proj[token] = embeds[token]@W_x + b.
    Vocab is padded to a sublane multiple, classes to the 128-lane width.
    """
    W_x_fused = jnp.concatenate(
        [params["W_gx"].T, params["W_ix"].T, params["W_fx"].T, params["W_ox"].T],
        axis=1,
    )  # (D, 4H)
    W_h_fused = jnp.concatenate(
        [params["W_gh"].T, params["W_ih"].T, params["W_fh"].T, params["W_oh"].T],
        axis=1,
    )  # (H, 4H)
    b_fused = jnp.concatenate(
        [params["b_g"], params["b_i"], params["b_f"], params["b_o"]]
    )  # (4H,)
    emb_proj = params["embedding"] @ W_x_fused + b_fused[None, :]  # (V, 4H)

    V = emb_proj.shape[0]
    Vp = _round_up(V, SUBLANE)
    emb_proj = jnp.pad(emb_proj, ((0, Vp - V), (0, 0)))

    C, _ = params["W_ph"].shape
    Cp = _round_up(C, LANE)
    W_ph_T = jnp.pad(params["W_ph"].T, ((0, 0), (0, Cp - C)))                 # (H, Cp)
    b_p = jnp.pad(params["b_p"], (0, Cp - C), constant_values=-1e30)          # (Cp,)

    # TODO(synk): for huge vocab, store emb_proj/W_h_fused in bf16 (f32 accum)
    # to halve weight DMA bytes; kept f32 here to preserve 1e-5 tolerance.
    return dict(
        emb_proj=emb_proj.astype(jnp.float32),
        W_h_fused=W_h_fused.astype(jnp.float32),
        W_ph_T=W_ph_T.astype(jnp.float32),
        b_p=b_p.reshape(1, Cp).astype(jnp.float32),
    )


def _pick_batch_tile(batch):
    # At least one full f32 sublane tile of rows, at most 128 rows per step.
    return min(MAX_BATCH_TILE, _round_up(max(batch, SUBLANE), SUBLANE))


@functools.partial(jax.jit, static_argnames=("num_classes",))
def lstm_forward(x_tokens, fused, *, num_classes):
    # x_tokens: (B, S, 1) int token ids (palindrome-dataset layout).
    tokens = jnp.squeeze(x_tokens, axis=-1).astype(jnp.int32)   # (B, S)
    B, S = tokens.shape

    emb_proj = fused["emb_proj"]      # (Vp, 4H)
    wh = fused["W_h_fused"]           # (H, 4H)
    wph = fused["W_ph_T"]             # (H, Cp)
    bp = fused["b_p"]                 # (1, Cp)
    H, Cp = wph.shape
    Vp, G4H = emb_proj.shape

    TB = _pick_batch_tile(B)
    B_pad = _round_up(B, TB)

    # (S, B_pad, 1) token slab — only the tiny index array is transposed/padded.
    tok_sb = jnp.transpose(tokens)[:, :, None]
    if B_pad != B:
        tok_sb = jnp.pad(tok_sb, ((0, 0), (0, B_pad - B), (0, 0)))

    out = pl.pallas_call(
        lstm_kernel,
        out_shape=jax.ShapeDtypeStruct((B_pad, Cp), jnp.float32),
        grid=(B_pad // TB,),
        in_specs=[
            pl.BlockSpec((S, TB, 1), lambda b: (0, b, 0)),   # per-tile tokens
            pl.BlockSpec((Vp, G4H), lambda b: (0, 0)),       # emb_proj (resident)
            pl.BlockSpec((H, G4H), lambda b: (0, 0)),        # W_h_fused
            pl.BlockSpec((H, Cp), lambda b: (0, 0)),         # W_ph^T
            pl.BlockSpec((1, Cp), lambda b: (0, 0)),         # b_p
        ],
        out_specs=pl.BlockSpec((TB, Cp), lambda b: (b, 0)),
        compiler_params=pltpu.CompilerParams(
            # Independent batch tiles -> megacore sharding on v7x (2 TCs).
            dimension_semantics=("parallel",),
            # Explicit VMEM budget: tiles here are tiny; stays far under the
            # v7x 64 MiB physical limit and the v5e/v6e scoped defaults.
            vmem_limit_bytes=32 * 1024 * 1024,
        ),
    )(tok_sb, emb_proj, wh, wph, bp)

    # Drop batch padding rows and padded class lanes.
    return out[:B, :num_classes]


def reference_forward(x_tokens, params):
    """Pure-JAX re-implementation of the PyTorch forward, for verification."""
    tokens = jnp.squeeze(x_tokens, axis=-1).astype(jnp.int32)
    x = params["embedding"][tokens]                 # (B, S, D)
    B, S, _ = x.shape
    H = params["W_gh"].shape[0]
    h = jnp.zeros((H, B), jnp.float32)
    c = jnp.zeros((H, B), jnp.float32)
    for i in range(S):
        xi = x[:, i, :].T                           # (D, B)
        g = jnp.tanh(params["W_gx"] @ xi + params["W_gh"] @ h + params["b_g"][:, None])
        i_ = jax.nn.sigmoid(params["W_ix"] @ xi + params["W_ih"] @ h + params["b_i"][:, None])
        f = jax.nn.sigmoid(params["W_fx"] @ xi + params["W_fh"] @ h + params["b_f"][:, None])
        o = jax.nn.sigmoid(params["W_ox"] @ xi + params["W_oh"] @ h + params["b_o"][:, None])
        c = g * i_ + c * f
        h = jnp.tanh(c) * o
    y = params["W_ph"] @ h + params["b_p"][:, None]  # (C, B)
    y = jax.nn.log_softmax(y, axis=0)
    return y.T                                       # (B, C)


if __name__ == "__main__":
    SEQ_LEN = 8
    INPUT_DIM = 10     # vocab size == embedding dim (as in the module)
    HIDDEN_DIM = 32    # 4H = 128 -> per-step gate slab is exactly lane-width
    NUM_CLASSES = 10
    BATCH = 2

    key = jax.random.PRNGKey(0)
    pkey, xkey = jax.random.split(key)
    params = init_params(pkey, INPUT_DIM, HIDDEN_DIM, NUM_CLASSES)
    fused = fuse_params(params)   # one-time weight fusion / transpose / padding

    # Token ids, shape (B, S, 1) like the palindrome dataset the module expects.
    x_tokens = jax.random.randint(xkey, (BATCH, SEQ_LEN, 1), 0, INPUT_DIM, dtype=jnp.int32)

    out = lstm_forward(x_tokens, fused, num_classes=NUM_CLASSES)
    out = jax.block_until_ready(out)

    ref = reference_forward(x_tokens, params)
    assert out.shape == (BATCH, NUM_CLASSES)
    assert jnp.allclose(out, ref, atol=1e-5, rtol=1e-5), "mismatch vs reference"

    print("KERNEL_OK")
</pallas_src>

<mosaic_0001>
module attributes {stable_mosaic.version = 11 : i64} {
  func.func @lstm_kernel(%arg0: i32, %arg1: memref<8x8x1xi32, #tpu.memory_space<vmem>>, %arg2: memref<16x128xf32, #tpu.memory_space<vmem>>, %arg3: memref<32x128xf32, #tpu.memory_space<vmem>>, %arg4: memref<32x128xf32, #tpu.memory_space<vmem>>, %arg5: memref<1x128xf32, #tpu.memory_space<vmem>>, %arg6: memref<8x128xf32, #tpu.memory_space<vmem>>) attributes {dimension_semantics = [#tpu.dimension_semantics<parallel>], iteration_bounds = array<i64: 1>, scalar_prefetch = 0 : i64, scratch_operands = 0 : i64, tpu.core_type = #tpu.core_type<tc>, window_params = [{transform_indices = @transform_0, window_bounds = array<i64: 8, 8, 1>}, {pipeline_mode = #tpu.pipeline_mode<synchronous>, transform_indices = @transform_1, window_bounds = array<i64: 16, 128>}, {pipeline_mode = #tpu.pipeline_mode<synchronous>, transform_indices = @transform_2, window_bounds = array<i64: 32, 128>}, {pipeline_mode = #tpu.pipeline_mode<synchronous>, transform_indices = @transform_3, window_bounds = array<i64: 32, 128>}, {pipeline_mode = #tpu.pipeline_mode<synchronous>, transform_indices = @transform_4, window_bounds = array<i64: 1, 128>}, {transform_indices = @transform_5, window_bounds = array<i64: 8, 128>}]} {
    %c0 = arith.constant 0 : index
    %c0_0 = arith.constant 0 : index
    %0 = vector.load %arg2[%c0, %c0_0] : memref<16x128xf32, #tpu.memory_space<vmem>>, vector<16x128xf32>
    %c0_1 = arith.constant 0 : index
    %c0_2 = arith.constant 0 : index
    %1 = vector.load %arg3[%c0_1, %c0_2] : memref<32x128xf32, #tpu.memory_space<vmem>>, vector<32x128xf32>
    %cst = arith.constant 0.000000e+00 : f32
    %2 = vector.broadcast %cst : f32 to vector<8x32xf32>
    %cst_3 = arith.constant 0.000000e+00 : f32
    %3 = vector.broadcast %cst_3 : f32 to vector<8x32xf32>
    %c0_i32 = arith.constant 0 : i32
    %4 = arith.index_cast %c0_i32 : i32 to index
    %c0_4 = arith.constant 0 : index
    %c0_5 = arith.constant 0 : index
    %5 = vector.load %arg1[%4, %c0_4, %c0_5] : memref<8x8x1xi32, #tpu.memory_space<vmem>>, vector<1x8x1xi32>
    %6 = vector.shape_cast %5 : vector<1x8x1xi32> to vector<8x1xi32>
    %7 = tpu.iota {dimensions = array<i32: 1>} : vector<8x16xi32>
    %8 = vector.broadcast %6 : vector<8x1xi32> to vector<8x16xi32>
    %9 = arith.cmpi eq, %8, %7 : vector<8x16xi32>
    %10 = arith.extui %9 : vector<8x16xi1> to vector<8x16xi32>
    %11 = arith.sitofp %10 : vector<8x16xi32> to vector<8x16xf32>
    %cst_6 = arith.constant dense<0.000000e+00> : vector<8x128xf32>
    %12 = tpu.matmul %11, %0, %cst_6 {dimension_numbers = #tpu.dot_dimension_numbers<[1], [0], [0], [1], [0, 0, 1, 1], [], []>} : vector<8x16xf32>, vector<16x128xf32>, vector<8x128xf32> -> vector<8x128xf32>
    %cst_7 = arith.constant dense<0.000000e+00> : vector<8x128xf32>
    %13 = tpu.matmul %2, %1, %cst_7 {dimension_numbers = #tpu.dot_dimension_numbers<[1], [0], [0], [1], [0, 0, 1, 1], [], []>} : vector<8x32xf32>, vector<32x128xf32>, vector<8x128xf32> -> vector<8x128xf32>
    %14 = arith.addf %12, %13 : vector<8x128xf32>
    %15 = arith.negf %14 : vector<8x128xf32>
    %16 = math.exp %15 : vector<8x128xf32>
    %cst_8 = arith.constant 1.000000e+00 : f32
    %17 = vector.broadcast %cst_8 : f32 to vector<8x128xf32>
    %18 = arith.addf %17, %16 : vector<8x128xf32>
    %19 = arith.divf %17, %18 : vector<8x128xf32>
    %20 = math.tanh %14 : vector<8x128xf32>
    %21 = vector.extract_strided_slice %20 {offsets = [0, 0], sizes = [8, 32], strides = [1, 1]} : vector<8x128xf32> to vector<8x32xf32>
    %22 = vector.extract_strided_slice %19 {offsets = [0, 32], sizes = [8, 32], strides = [1, 1]} : vector<8x128xf32> to vector<8x32xf32>
    %23 = vector.extract_strided_slice %19 {offsets = [0, 64], sizes = [8, 32], strides = [1, 1]} : vector<8x128xf32> to vector<8x32xf32>
    %24 = vector.extract_strided_slice %19 {offsets = [0, 96], sizes = [8, 32], strides = [1, 1]} : vector<8x128xf32> to vector<8x32xf32>
    %25 = arith.mulf %21, %22 : vector<8x32xf32>
    %26 = arith.mulf %3, %23 : vector<8x32xf32>
    %27 = arith.addf %25, %26 : vector<8x32xf32>
    %28 = math.tanh %27 : vector<8x32xf32>
    %29 = arith.mulf %28, %24 : vector<8x32xf32>
    %c1_i32 = arith.constant 1 : i32
    %30 = arith.index_cast %c1_i32 : i32 to index
    %c0_9 = arith.constant 0 : index
    %c0_10 = arith.constant 0 : index
    %31 = vector.load %arg1[%30, %c0_9, %c0_10] : memref<8x8x1xi32, #tpu.memory_space<vmem>>, vector<1x8x1xi32>
    %32 = vector.shape_cast %31 : vector<1x8x1xi32> to vector<8x1xi32>
    %33 = tpu.iota {dimensions = array<i32: 1>} : vector<8x16xi32>
    %34 = vector.broadcast %32 : vector<8x1xi32> to vector<8x16xi32>
    %35 = arith.cmpi eq, %34, %33 : vector<8x16xi32>
    %36 = arith.extui %35 : vector<8x16xi1> to vector<8x16xi32>
    %37 = arith.sitofp %36 : vector<8x16xi32> to vector<8x16xf32>
    %cst_11 = arith.constant dense<0.000000e+00> : vector<8x128xf32>
    %38 = tpu.matmul %37, %0, %cst_11 {dimension_numbers = #tpu.dot_dimension_numbers<[1], [0], [0], [1], [0, 0, 1, 1], [], []>} : vector<8x16xf32>, vector<16x128xf32>, vector<8x128xf32> -> vector<8x128xf32>
    %cst_12 = arith.constant dense<0.000000e+00> : vector<8x128xf32>
    %39 = tpu.matmul %29, %1, %cst_12 {dimension_numbers = #tpu.dot_dimension_numbers<[1], [0], [0], [1], [0, 0, 1, 1], [], []>} : vector<8x32xf32>, vector<32x128xf32>, vector<8x128xf32> -> vector<8x128xf32>
    %40 = arith.addf %38, %39 : vector<8x128xf32>
    %41 = arith.negf %40 : vector<8x128xf32>
    %42 = math.exp %41 : vector<8x128xf32>
    %cst_13 = arith.constant 1.000000e+00 : f32
    %43 = vector.broadcast %cst_13 : f32 to vector<8x128xf32>
    %44 = arith.addf %43, %42 : vector<8x128xf32>
    %45 = arith.divf %43, %44 : vector<8x128xf32>
    %46 = math.tanh %40 : vector<8x128xf32>
    %47 = vector.extract_strided_slice %46 {offsets = [0, 0], sizes = [8, 32], strides = [1, 1]} : vector<8x128xf32> to vector<8x32xf32>
    %48 = vector.extract_strided_slice %45 {offsets = [0, 32], sizes = [8, 32], strides = [1, 1]} : vector<8x128xf32> to vector<8x32xf32>
    %49 = vector.extract_strided_slice %45 {offsets = [0, 64], sizes = [8, 32], strides = [1, 1]} : vector<8x128xf32> to vector<8x32xf32>
    %50 = vector.extract_strided_slice %45 {offsets = [0, 96], sizes = [8, 32], strides = [1, 1]} : vector<8x128xf32> to vector<8x32xf32>
    %51 = arith.mulf %47, %48 : vector<8x32xf32>
    %52 = arith.mulf %27, %49 : vector<8x32xf32>
    %53 = arith.addf %51, %52 : vector<8x32xf32>
    %54 = math.tanh %53 : vector<8x32xf32>
    %55 = arith.mulf %54, %50 : vector<8x32xf32>
    %c2_i32 = arith.constant 2 : i32
    %56 = arith.index_cast %c2_i32 : i32 to index
    %c0_14 = arith.constant 0 : index
    %c0_15 = arith.constant 0 : index
    %57 = vector.load %arg1[%56, %c0_14, %c0_15] : memref<8x8x1xi32, #tpu.memory_space<vmem>>, vector<1x8x1xi32>
    %58 = vector.shape_cast %57 : vector<1x8x1xi32> to vector<8x1xi32>
    %59 = tpu.iota {dimensions = array<i32: 1>} : vector<8x16xi32>
    %60 = vector.broadcast %58 : vector<8x1xi32> to vector<8x16xi32>
    %61 = arith.cmpi eq, %60, %59 : vector<8x16xi32>
    %62 = arith.extui %61 : vector<8x16xi1> to vector<8x16xi32>
    %63 = arith.sitofp %62 : vector<8x16xi32> to vector<8x16xf32>
    %cst_16 = arith.constant dense<0.000000e+00> : vector<8x128xf32>
    %64 = tpu.matmul %63, %0, %cst_16 {dimension_numbers = #tpu.dot_dimension_numbers<[1], [0], [0], [1], [0, 0, 1, 1], [], []>} : vector<8x16xf32>, vector<16x128xf32>, vector<8x128xf32> -> vector<8x128xf32>
    %cst_17 = arith.constant dense<0.000000e+00> : vector<8x128xf32>
    %65 = tpu.matmul %55, %1, %cst_17 {dimension_numbers = #tpu.dot_dimension_numbers<[1], [0], [0], [1], [0, 0, 1, 1], [], []>} : vector<8x32xf32>, vector<32x128xf32>, vector<8x128xf32> -> vector<8x128xf32>
    %66 = arith.addf %64, %65 : vector<8x128xf32>
    %67 = arith.negf %66 : vector<8x128xf32>
    %68 = math.exp %67 : vector<8x128xf32>
    %cst_18 = arith.constant 1.000000e+00 : f32
    %69 = vector.broadcast %cst_18 : f32 to vector<8x128xf32>
    %70 = arith.addf %69, %68 : vector<8x128xf32>
    %71 = arith.divf %69, %70 : vector<8x128xf32>
    %72 = math.tanh %66 : vector<8x128xf32>
    %73 = vector.extract_strided_slice %72 {offsets = [0, 0], sizes = [8, 32], strides = [1, 1]} : vector<8x128xf32> to vector<8x32xf32>
    %74 = vector.extract_strided_slice %71 {offsets = [0, 32], sizes = [8, 32], strides = [1, 1]} : vector<8x128xf32> to vector<8x32xf32>
    %75 = vector.extract_strided_slice %71 {offsets = [0, 64], sizes = [8, 32], strides = [1, 1]} : vector<8x128xf32> to vector<8x32xf32>
    %76 = vector.extract_strided_slice %71 {offsets = [0, 96], sizes = [8, 32], strides = [1, 1]} : vector<8x128xf32> to vector<8x32xf32>
    %77 = arith.mulf %73, %74 : vector<8x32xf32>
    %78 = arith.mulf %53, %75 : vector<8x32xf32>
    %79 = arith.addf %77, %78 : vector<8x32xf32>
    %80 = math.tanh %79 : vector<8x32xf32>
    %81 = arith.mulf %80, %76 : vector<8x32xf32>
    %c3_i32 = arith.constant 3 : i32
    %82 = arith.index_cast %c3_i32 : i32 to index
    %c0_19 = arith.constant 0 : index
    %c0_20 = arith.constant 0 : index
    %83 = vector.load %arg1[%82, %c0_19, %c0_20] : memref<8x8x1xi32, #tpu.memory_space<vmem>>, vector<1x8x1xi32>
    %84 = vector.shape_cast %83 : vector<1x8x1xi32> to vector<8x1xi32>
    %85 = tpu.iota {dimensions = array<i32: 1>} : vector<8x16xi32>
    %86 = vector.broadcast %84 : vector<8x1xi32> to vector<8x16xi32>
    %87 = arith.cmpi eq, %86, %85 : vector<8x16xi32>
    %88 = arith.extui %87 : vector<8x16xi1> to vector<8x16xi32>
    %89 = arith.sitofp %88 : vector<8x16xi32> to vector<8x16xf32>
    %cst_21 = arith.constant dense<0.000000e+00> : vector<8x128xf32>
    %90 = tpu.matmul %89, %0, %cst_21 {dimension_numbers = #tpu.dot_dimension_numbers<[1], [0], [0], [1], [0, 0, 1, 1], [], []>} : vector<8x16xf32>, vector<16x128xf32>, vector<8x128xf32> -> vector<8x128xf32>
    %cst_22 = arith.constant dense<0.000000e+00> : vector<8x128xf32>
    %91 = tpu.matmul %81, %1, %cst_22 {dimension_numbers = #tpu.dot_dimension_numbers<[1], [0], [0], [1], [0, 0, 1, 1], [], []>} : vector<8x32xf32>, vector<32x128xf32>, vector<8x128xf32> -> vector<8x128xf32>
    %92 = arith.addf %90, %91 : vector<8x128xf32>
    %93 = arith.negf %92 : vector<8x128xf32>
    %94 = math.exp %93 : vector<8x128xf32>
    %cst_23 = arith.constant 1.000000e+00 : f32
    %95 = vector.broadcast %cst_23 : f32 to vector<8x128xf32>
    %96 = arith.addf %95, %94 : vector<8x128xf32>
    %97 = arith.divf %95, %96 : vector<8x128xf32>
    %98 = math.tanh %92 : vector<8x128xf32>
    %99 = vector.extract_strided_slice %98 {offsets = [0, 0], sizes = [8, 32], strides = [1, 1]} : vector<8x128xf32> to vector<8x32xf32>
    %100 = vector.extract_strided_slice %97 {offsets = [0, 32], sizes = [8, 32], strides = [1, 1]} : vector<8x128xf32> to vector<8x32xf32>
    %101 = vector.extract_strided_slice %97 {offsets = [0, 64], sizes = [8, 32], strides = [1, 1]} : vector<8x128xf32> to vector<8x32xf32>
    %102 = vector.extract_strided_slice %97 {offsets = [0, 96], sizes = [8, 32], strides = [1, 1]} : vector<8x128xf32> to vector<8x32xf32>
    %103 = arith.mulf %99, %100 : vector<8x32xf32>
    %104 = arith.mulf %79, %101 : vector<8x32xf32>
    %105 = arith.addf %103, %104 : vector<8x32xf32>
    %106 = math.tanh %105 : vector<8x32xf32>
    %107 = arith.mulf %106, %102 : vector<8x32xf32>
    %c4_i32 = arith.constant 4 : i32
    %108 = arith.index_cast %c4_i32 : i32 to index
    %c0_24 = arith.constant 0 : index
    %c0_25 = arith.constant 0 : index
    %109 = vector.load %arg1[%108, %c0_24, %c0_25] : memref<8x8x1xi32, #tpu.memory_space<vmem>>, vector<1x8x1xi32>
    %110 = vector.shape_cast %109 : vector<1x8x1xi32> to vector<8x1xi32>
    %111 = tpu.iota {dimensions = array<i32: 1>} : vector<8x16xi32>
    %112 = vector.broadcast %110 : vector<8x1xi32> to vector<8x16xi32>
    %113 = arith.cmpi eq, %112, %111 : vector<8x16xi32>
    %114 = arith.extui %113 : vector<8x16xi1> to vector<8x16xi32>
    %115 = arith.sitofp %114 : vector<8x16xi32> to vector<8x16xf32>
    %cst_26 = arith.constant dense<0.000000e+00> : vector<8x128xf32>
    %116 = tpu.matmul %115, %0, %cst_26 {dimension_numbers = #tpu.dot_dimension_numbers<[1], [0], [0], [1], [0, 0, 1, 1], [], []>} : vector<8x16xf32>, vector<16x128xf32>, vector<8x128xf32> -> vector<8x128xf32>
    %cst_27 = arith.constant dense<0.000000e+00> : vector<8x128xf32>
    %117 = tpu.matmul %107, %1, %cst_27 {dimension_numbers = #tpu.dot_dimension_numbers<[1], [0], [0], [1], [0, 0, 1, 1], [], []>} : vector<8x32xf32>, vector<32x128xf32>, vector<8x128xf32> -> vector<8x128xf32>
    %118 = arith.addf %116, %117 : vector<8x128xf32>
    %119 = arith.negf %118 : vector<8x128xf32>
    %120 = math.exp %119 : vector<8x128xf32>
    %cst_28 = arith.constant 1.000000e+00 : f32
    %121 = vector.broadcast %cst_28 : f32 to vector<8x128xf32>
    %122 = arith.addf %121, %120 : vector<8x128xf32>
    %123 = arith.divf %121, %122 : vector<8x128xf32>
    %124 = math.tanh %118 : vector<8x128xf32>
    %125 = vector.extract_strided_slice %124 {offsets = [0, 0], sizes = [8, 32], strides = [1, 1]} : vector<8x128xf32> to vector<8x32xf32>
    %126 = vector.extract_strided_slice %123 {offsets = [0, 32], sizes = [8, 32], strides = [1, 1]} : vector<8x128xf32> to vector<8x32xf32>
    %127 = vector.extract_strided_slice %123 {offsets = [0, 64], sizes = [8, 32], strides = [1, 1]} : vector<8x128xf32> to vector<8x32xf32>
    %128 = vector.extract_strided_slice %123 {offsets = [0, 96], sizes = [8, 32], strides = [1, 1]} : vector<8x128xf32> to vector<8x32xf32>
    %129 = arith.mulf %125, %126 : vector<8x32xf32>
    %130 = arith.mulf %105, %127 : vector<8x32xf32>
    %131 = arith.addf %129, %130 : vector<8x32xf32>
    %132 = math.tanh %131 : vector<8x32xf32>
    %133 = arith.mulf %132, %128 : vector<8x32xf32>
    %c5_i32 = arith.constant 5 : i32
    %134 = arith.index_cast %c5_i32 : i32 to index
    %c0_29 = arith.constant 0 : index
    %c0_30 = arith.constant 0 : index
    %135 = vector.load %arg1[%134, %c0_29, %c0_30] : memref<8x8x1xi32, #tpu.memory_space<vmem>>, vector<1x8x1xi32>
    %136 = vector.shape_cast %135 : vector<1x8x1xi32> to vector<8x1xi32>
    %137 = tpu.iota {dimensions = array<i32: 1>} : vector<8x16xi32>
    %138 = vector.broadcast %136 : vector<8x1xi32> to vector<8x16xi32>
    %139 = arith.cmpi eq, %138, %137 : vector<8x16xi32>
    %140 = arith.extui %139 : vector<8x16xi1> to vector<8x16xi32>
    %141 = arith.sitofp %140 : vector<8x16xi32> to vector<8x16xf32>
    %cst_31 = arith.constant dense<0.000000e+00> : vector<8x128xf32>
    %142 = tpu.matmul %141, %0, %cst_31 {dimension_numbers = #tpu.dot_dimension_numbers<[1], [0], [0], [1], [0, 0, 1, 1], [], []>} : vector<8x16xf32>, vector<16x128xf32>, vector<8x128xf32> -> vector<8x128xf32>
    %cst_32 = arith.constant dense<0.000000e+00> : vector<8x128xf32>
    %143 = tpu.matmul %133, %1, %cst_32 {dimension_numbers = #tpu.dot_dimension_numbers<[1], [0], [0], [1], [0, 0, 1, 1], [], []>} : vector<8x32xf32>, vector<32x128xf32>, vector<8x128xf32> -> vector<8x128xf32>
    %144 = arith.addf %142, %143 : vector<8x128xf32>
    %145 = arith.negf %144 : vector<8x128xf32>
    %146 = math.exp %145 : vector<8x128xf32>
    %cst_33 = arith.constant 1.000000e+00 : f32
    %147 = vector.broadcast %cst_33 : f32 to vector<8x128xf32>
    %148 = arith.addf %147, %146 : vector<8x128xf32>
    %149 = arith.divf %147, %148 : vector<8x128xf32>
    %150 = math.tanh %144 : vector<8x128xf32>
    %151 = vector.extract_strided_slice %150 {offsets = [0, 0], sizes = [8, 32], strides = [1, 1]} : vector<8x128xf32> to vector<8x32xf32>
    %152 = vector.extract_strided_slice %149 {offsets = [0, 32], sizes = [8, 32], strides = [1, 1]} : vector<8x128xf32> to vector<8x32xf32>
    %153 = vector.extract_strided_slice %149 {offsets = [0, 64], sizes = [8, 32], strides = [1, 1]} : vector<8x128xf32> to vector<8x32xf32>
    %154 = vector.extract_strided_slice %149 {offsets = [0, 96], sizes = [8, 32], strides = [1, 1]} : vector<8x128xf32> to vector<8x32xf32>
    %155 = arith.mulf %151, %152 : vector<8x32xf32>
    %156 = arith.mulf %131, %153 : vector<8x32xf32>
    %157 = arith.addf %155, %156 : vector<8x32xf32>
    %158 = math.tanh %157 : vector<8x32xf32>
    %159 = arith.mulf %158, %154 : vector<8x32xf32>
    %c6_i32 = arith.constant 6 : i32
    %160 = arith.index_cast %c6_i32 : i32 to index
    %c0_34 = arith.constant 0 : index
    %c0_35 = arith.constant 0 : index
    %161 = vector.load %arg1[%160, %c0_34, %c0_35] : memref<8x8x1xi32, #tpu.memory_space<vmem>>, vector<1x8x1xi32>
    %162 = vector.shape_cast %161 : vector<1x8x1xi32> to vector<8x1xi32>
    %163 = tpu.iota {dimensions = array<i32: 1>} : vector<8x16xi32>
    %164 = vector.broadcast %162 : vector<8x1xi32> to vector<8x16xi32>
    %165 = arith.cmpi eq, %164, %163 : vector<8x16xi32>
    %166 = arith.extui %165 : vector<8x16xi1> to vector<8x16xi32>
    %167 = arith.sitofp %166 : vector<8x16xi32> to vector<8x16xf32>
    %cst_36 = arith.constant dense<0.000000e+00> : vector<8x128xf32>
    %168 = tpu.matmul %167, %0, %cst_36 {dimension_numbers = #tpu.dot_dimension_numbers<[1], [0], [0], [1], [0, 0, 1, 1], [], []>} : vector<8x16xf32>, vector<16x128xf32>, vector<8x128xf32> -> vector<8x128xf32>
    %cst_37 = arith.constant dense<0.000000e+00> : vector<8x128xf32>
    %169 = tpu.matmul %159, %1, %cst_37 {dimension_numbers = #tpu.dot_dimension_numbers<[1], [0], [0], [1], [0, 0, 1, 1], [], []>} : vector<8x32xf32>, vector<32x128xf32>, vector<8x128xf32> -> vector<8x128xf32>
    %170 = arith.addf %168, %169 : vector<8x128xf32>
    %171 = arith.negf %170 : vector<8x128xf32>
    %172 = math.exp %171 : vector<8x128xf32>
    %cst_38 = arith.constant 1.000000e+00 : f32
    %173 = vector.broadcast %cst_38 : f32 to vector<8x128xf32>
    %174 = arith.addf %173, %172 : vector<8x128xf32>
    %175 = arith.divf %173, %174 : vector<8x128xf32>
    %176 = math.tanh %170 : vector<8x128xf32>
    %177 = vector.extract_strided_slice %176 {offsets = [0, 0], sizes = [8, 32], strides = [1, 1]} : vector<8x128xf32> to vector<8x32xf32>
    %178 = vector.extract_strided_slice %175 {offsets = [0, 32], sizes = [8, 32], strides = [1, 1]} : vector<8x128xf32> to vector<8x32xf32>
    %179 = vector.extract_strided_slice %175 {offsets = [0, 64], sizes = [8, 32], strides = [1, 1]} : vector<8x128xf32> to vector<8x32xf32>
    %180 = vector.extract_strided_slice %175 {offsets = [0, 96], sizes = [8, 32], strides = [1, 1]} : vector<8x128xf32> to vector<8x32xf32>
    %181 = arith.mulf %177, %178 : vector<8x32xf32>
    %182 = arith.mulf %157, %179 : vector<8x32xf32>
    %183 = arith.addf %181, %182 : vector<8x32xf32>
    %184 = math.tanh %183 : vector<8x32xf32>
    %185 = arith.mulf %184, %180 : vector<8x32xf32>
    %c7_i32 = arith.constant 7 : i32
    %186 = arith.index_cast %c7_i32 : i32 to index
    %c0_39 = arith.constant 0 : index
    %c0_40 = arith.constant 0 : index
    %187 = vector.load %arg1[%186, %c0_39, %c0_40] : memref<8x8x1xi32, #tpu.memory_space<vmem>>, vector<1x8x1xi32>
    %188 = vector.shape_cast %187 : vector<1x8x1xi32> to vector<8x1xi32>
    %189 = tpu.iota {dimensions = array<i32: 1>} : vector<8x16xi32>
    %190 = vector.broadcast %188 : vector<8x1xi32> to vector<8x16xi32>
    %191 = arith.cmpi eq, %190, %189 : vector<8x16xi32>
    %192 = arith.extui %191 : vector<8x16xi1> to vector<8x16xi32>
    %193 = arith.sitofp %192 : vector<8x16xi32> to vector<8x16xf32>
    %cst_41 = arith.constant dense<0.000000e+00> : vector<8x128xf32>
    %194 = tpu.matmul %193, %0, %cst_41 {dimension_numbers = #tpu.dot_dimension_numbers<[1], [0], [0], [1], [0, 0, 1, 1], [], []>} : vector<8x16xf32>, vector<16x128xf32>, vector<8x128xf32> -> vector<8x128xf32>
    %cst_42 = arith.constant dense<0.000000e+00> : vector<8x128xf32>
    %195 = tpu.matmul %185, %1, %cst_42 {dimension_numbers = #tpu.dot_dimension_numbers<[1], [0], [0], [1], [0, 0, 1, 1], [], []>} : vector<8x32xf32>, vector<32x128xf32>, vector<8x128xf32> -> vector<8x128xf32>
    %196 = arith.addf %194, %195 : vector<8x128xf32>
    %197 = arith.negf %196 : vector<8x128xf32>
    %198 = math.exp %197 : vector<8x128xf32>
    %cst_43 = arith.constant 1.000000e+00 : f32
    %199 = vector.broadcast %cst_43 : f32 to vector<8x128xf32>
    %200 = arith.addf %199, %198 : vector<8x128xf32>
    %201 = arith.divf %199, %200 : vector<8x128xf32>
    %202 = math.tanh %196 : vector<8x128xf32>
    %203 = vector.extract_strided_slice %202 {offsets = [0, 0], sizes = [8, 32], strides = [1, 1]} : vector<8x128xf32> to vector<8x32xf32>
    %204 = vector.extract_strided_slice %201 {offsets = [0, 32], sizes = [8, 32], strides = [1, 1]} : vector<8x128xf32> to vector<8x32xf32>
    %205 = vector.extract_strided_slice %201 {offsets = [0, 64], sizes = [8, 32], strides = [1, 1]} : vector<8x128xf32> to vector<8x32xf32>
    %206 = vector.extract_strided_slice %201 {offsets = [0, 96], sizes = [8, 32], strides = [1, 1]} : vector<8x128xf32> to vector<8x32xf32>
    %207 = arith.mulf %203, %204 : vector<8x32xf32>
    %208 = arith.mulf %183, %205 : vector<8x32xf32>
    %209 = arith.addf %207, %208 : vector<8x32xf32>
    %210 = math.tanh %209 : vector<8x32xf32>
    %211 = arith.mulf %210, %206 : vector<8x32xf32>
    %c8_i32 = arith.constant 8 : i32
    %c0_44 = arith.constant 0 : index
    %c0_45 = arith.constant 0 : index
    %212 = vector.load %arg4[%c0_44, %c0_45] : memref<32x128xf32, #tpu.memory_space<vmem>>, vector<32x128xf32>
    %cst_46 = arith.constant dense<0.000000e+00> : vector<8x128xf32>
    %213 = tpu.matmul %211, %212, %cst_46 {dimension_numbers = #tpu.dot_dimension_numbers<[1], [0], [0], [1], [0, 0, 1, 1], [], []>} : vector<8x32xf32>, vector<32x128xf32>, vector<8x128xf32> -> vector<8x128xf32>
    %c0_47 = arith.constant 0 : index
    %c0_48 = arith.constant 0 : index
    %214 = vector.load %arg5[%c0_47, %c0_48] : memref<1x128xf32, #tpu.memory_space<vmem>>, vector<1x128xf32>
    %215 = vector.broadcast %214 : vector<1x128xf32> to vector<8x128xf32>
    %216 = arith.addf %213, %215 : vector<8x128xf32>
    %cst_49 = arith.constant dense<0xFF800000> : vector<8xf32>
    %217 = vector.multi_reduction <maximumf>, %216, %cst_49 [1] : vector<8x128xf32> to vector<8xf32>
    %218 = vector.shape_cast %217 : vector<8xf32> to vector<8x1xf32>
    %219 = vector.broadcast %218 : vector<8x1xf32> to vector<8x128xf32>
    %220 = arith.subf %216, %219 : vector<8x128xf32>
    %221 = math.exp %220 : vector<8x128xf32>
    %cst_50 = arith.constant dense<0.000000e+00> : vector<8xf32>
    %222 = vector.multi_reduction <add>, %221, %cst_50 [1] : vector<8x128xf32> to vector<8xf32>
    %223 = vector.shape_cast %222 : vector<8xf32> to vector<8x1xf32>
    %224 = math.log %223 : vector<8x1xf32>
    %225 = vector.broadcast %224 : vector<8x1xf32> to vector<8x128xf32>
    %226 = arith.subf %220, %225 : vector<8x128xf32>
    %c0_51 = arith.constant 0 : index
    %c0_52 = arith.constant 0 : index
    %227 = vector.load %arg6[%c0_51, %c0_52] : memref<8x128xf32, #tpu.memory_space<vmem>>, vector<8x128xf32>
    tpu.vector_store %arg6[%c0_51, %c0_52], %226 {strides = array<i32>} : memref<8x128xf32, #tpu.memory_space<vmem>>, vector<8x128xf32>,
    return
  }
  func.func @transform_0(%arg0: i32) -> (i32, i32, i32) {
    %c0_i32 = arith.constant 0 : i32
    %c0_i32_0 = arith.constant 0 : i32
    %c0_i32_1 = arith.constant 0 : i32
    return %c0_i32, %arg0, %c0_i32_0 : i32, i32, i32
  }
  func.func @transform_1(%arg0: i32) -> (i32, i32) {
    %c0_i32 = arith.constant 0 : i32
    %c0_i32_0 = arith.constant 0 : i32
    %c0_i32_1 = arith.constant 0 : i32
    return %c0_i32, %c0_i32_0 : i32, i32
  }
  func.func @transform_2(%arg0: i32) -> (i32, i32) {
    %c0_i32 = arith.constant 0 : i32
    %c0_i32_0 = arith.constant 0 : i32
    %c0_i32_1 = arith.constant 0 : i32
    return %c0_i32, %c0_i32_0 : i32, i32
  }
  func.func @transform_3(%arg0: i32) -> (i32, i32) {
    %c0_i32 = arith.constant 0 : i32
    %c0_i32_0 = arith.constant 0 : i32
    %c0_i32_1 = arith.constant 0 : i32
    return %c0_i32, %c0_i32_0 : i32, i32
  }
  func.func @transform_4(%arg0: i32) -> (i32, i32) {
    %c0_i32 = arith.constant 0 : i32
    %c0_i32_0 = arith.constant 0 : i32
    %c0_i32_1 = arith.constant 0 : i32
    return %c0_i32, %c0_i32_0 : i32, i32
  }
  func.func @transform_5(%arg0: i32) -> (i32, i32) {
    %c0_i32 = arith.constant 0 : i32
    %c0_i32_0 = arith.constant 0 : i32
    return %arg0, %c0_i32 : i32, i32
  }
}

</mosaic_0001>

<bundles_post_ra>
// kernel: lstm_forward.1
= control target key start
LH: loop header
LB: loop body
LE: loop exit
PB: predicated region body
PF: predicated region fallthrough
CT: control target
= control target key end

     0   :  { %v1970_v0 = vmov 0   ;;  %v1971_v2 = vmov 0.0|0.0   ;;  %vm1972_vm0 = vmmov 0   ;;  %v1973_v10 = vmov 0.0   ;;  %s1975_s8 = smov 64   ;;  %s1976_s9 = smov 32   ;;  %s2216_s0 = inlined_call_operand.vmem [shape: s32[8,8,1], index: 0, kind: input, shape index: {}]   ;;  %s2217_s2 = inlined_call_operand.vmem [shape: f32[32,128], index: 2, kind: input, shape index: {}]   ;;  %s2218_s1 = inlined_call_operand.vmem [shape: f32[16,128], index: 1, kind: input, shape index: {}]   ;;  %s2219_s3 = inlined_call_operand.vmem [shape: f32[32,128], index: 3, kind: input, shape index: {}]   ;;  %s2220_s4 = inlined_call_operand.vmem [shape: f32[1,128], index: 4, kind: input, shape index: {}]   ;;  %s2221_s5 = inlined_call_operand.vmem [shape: f32[8,128], index: 5, kind: output, shape index: {}]  }
   0x1   :  { %1901 = vset.pattern.permute.xlu0 %v1970_v0  ;;  %v26_v1 = vld [vmem:[%s2216_s0] sm:$0xff]  ;;  %1801 = vmatprep.subr.bf16.mxu0 %v1971_v2  ;;  %v23_v4 = vld [vmem:[%s2217_s2 + $0x8] sm:$0xff]  ;;  %v24_v6 = vld [vmem:[%s2217_s2 + $0x10] sm:$0xff]  ;;  %v27_v13 = vlaneseq  ;;  %vm109_vm1 = vcmask 130048   ;;  %vm35_vm3 = vcmask 261120  }
   0x2   :  { %v22_v3 = vld [vmem:[%s2217_s2] sm:$0xff]  ;;  %30 = vperm.xlu0 %1901, %v26_v1   ;;  %v25_v7 = vld [vmem:[%s2217_s2 + $0x18] sm:$0xff]  ;;  %1807 = vmatprep.subr.bf16.mxu1 %v1971_v2  ;;  %v21_v9 = vld [vmem:[%s2218_s1 + $0x8] sm:$0xff] }
   0x3   :  { %v2017_v5 = vpack.c.bf16 %v23_v4, %v22_v3  ;;  %v20_v8 = vld [vmem:[%s2218_s1] sm:$0xff]  ;;  %1654 = vmatprep.mubr.msk.f32.mxu0 %vm1972_vm0, %v1973_v10  ;;  %1661 = vmatprep.mubr.msk.f32.mxu1 %vm1972_vm0, %v1973_v10  ;;  %v2037_v11 = vpack.c.bf16 %v25_v7, %v24_v6  ;;  %v2053_v14 = vand.u32 127, %v27_v13  ;;  %s1974_s1 = smov 96   ;;  %v1540_v27 = vld [vmem:[%s2216_s0 + $0x8] sm:$0xff]  ;;  %v1545_v44 = vld [vmem:[%s2216_s0 + $0x10] sm:$0xff] }
   0x4   :  { %v2039_v12 = vpack.c.bf16 %v21_v9, %v20_v8  ;;  %v1550_v62 = vld [vmem:[%s2216_s0 + $0x18] sm:$0xff] }
   0x5   :  { %1803 = vmatpush3.bf16.msra.mxu0 %v2017_v5 }
   0x6   :  { %1804 = vmatprep.subr.bf16.mxu0 %v1971_v2  ;;  %1809 = vmatpush3.bf16.msra.mxu1 %v2039_v12 }
   0x7   :  { %1810 = vmatprep.subr.bf16.mxu1 %v1971_v2 }
   0x9   :  { %1806 = vmatpush3.bf16.msra.mxu0 %v2037_v11 }
   0xa   :  { %1819 = vmatprep.subr.bf16.mxu0 %v1971_v2 }
   0xc   :  { %1655 = vmatmul.mubr.f32.vlgmr.msra.gmra.mrb[0].mxu0 %v1973_v10 }
   0xd   :  { %1821 = vmatpush3.bf16.msra.mxu0 %v2017_v5  ;;  %1690 = vmatprep.mubr.msk.f32.mxu0 %vm1972_vm0, %v1973_v10 }
   0xe   :  { %1822 = vmatprep.subr.bf16.mxu0 %v1971_v2 }
  0x11   :  { %1824 = vmatpush3.bf16.msra.mxu0 %v2037_v11 }
  0x12   :  { %1825 = vmatprep.subr.bf16.mxu0 %v1971_v2 }
  0x81   :  { %v31_v15 = vpop.permute.xlu0 %30 }
  0x82   :  { %vm32_vm2 = vcmp.eq.s32.totalorder %v31_v15, %v2053_v14 }
  0x83   :  { %v1537_v16 = vsel %vm32_vm2, 1.0, %v1973_v10 }
  0x84   :  { %1662 = vmatmul.mubr.msk.f32.vlgmr.msra.gmra.mrb[0].mxu1 %vm109_vm1, %v1537_v16 }
  0x85   :  { %1812 = vmatpush3.bf16.msra.mxu1 %v2017_v5  ;;  %1672 = vmatprep.mubr.msk.f32.mxu1 %vm1972_vm0, %v1973_v10 }
  0x86   :  { %1813 = vmatprep.subr.bf16.mxu1 %v1971_v2 }
  0x89   :  { %1815 = vmatpush3.bf16.msra.mxu1 %v2037_v11 }
  0x8a   :  { %1816 = vmatprep.subr.bf16.mxu1 %v1971_v2 }
  0xdf   :  { %v105_v17 = vpop.f32.mrb[0].mxu0 }
  0xe0   :  { %v1656_v18 = vpop.f32.mrb[1].mxu0 }
 0x157   :  { %v179_v19 = vpop.f32.mrb[0].mxu1 }
 0x158   :  { %v180_v20 = vadd.f32 %v179_v19, %v105_v17  ;;  %v1663_v21 = vpop.f32.mrb[1].mxu1 }
 0x15a   :  { %v1539_v22 = vmul.f32 -1.442695, %v180_v20 }
 0x15c   :  { %1902 = vpow2.f32 %v1539_v22  ;;  %v1555_v22 = vld [vmem:[%s2216_s0 + $0x20] sm:$0xff] }
 0x166   :  { %v1903_v23 = vpop.eup %1902 }
 0x167   :  { %v186_v24 = vadd.f32 1.0, %v1903_v23 }
 0x169   :  { %1904 = vrcp.f32 %v186_v24 }
 0x16a   :  { %1906 = vtanh.f32 %v180_v20 }
 0x173   :  { %v1905_v25 = vpop.eup %1904 }
 0x174   :  { %191 = vrot.lane.b32.xlu0 %v1905_v25, %s1974_s1  ;;  %v195_v26 = vmul.f32 0.0, %v1905_v25  ;;  %v1907_v28 = vpop.eup %1906 }
 0x176   :  { %197 = vrot.lane.b32.xlu1 %v195_v26, %s1975_s8 }
 0x178   :  { %209 = vperm.xlu0 %1901, %v1540_v27  }
 0x17a   :  { %202 = vrot.lane.b32.xlu1 %v1905_v25, %s1976_s9 }
 0x1e6   :  { %v192_v29 = vpop.permute.xlu0 %191 }
 0x1e7   :  { %v194_v30 = vmul.f32 %v1907_v28, %v192_v29 }
 0x1e8   :  { %v198_v31 = vpop.permute.xlu1 %197 }
 0x1e9   :  { %v200_v32 = vadd.f32 %v198_v31, %v194_v30 }
 0x1eb   :  { %1908 = vtanh.f32 %v200_v32 }
 0x1ec   :  { %v203_v34 = vpop.permute.xlu1 %202 }
 0x1f5   :  { %v1909_v33 = vpop.eup %1908 }
 0x1f6   :  { %v205_v35 = vmul.f32 %v1909_v33, %v203_v34 }
 0x1f7   :  { %v210_v36 = vpop.permute.xlu0 %209 }
 0x1f8   :  { %1673 = vmatmul.mubr.msk.f32.vlgmr.msra.gmra.mrb[2].mxu1 %vm35_vm3, %v205_v35  ;;  %vm211_vm4 = vcmp.eq.s32.totalorder %v210_v36, %v2053_v14 }
 0x1f9   :  { %1818 = vmatpush3.bf16.msra.mxu1 %v2039_v12  ;;  %1679 = vmatprep.mubr.msk.f32.mxu1 %vm1972_vm0, %v1973_v10  ;;  %v1541_v37 = vsel %vm211_vm4, 1.0, %v1973_v10 }
 0x1fa   :  { %1828 = vmatprep.subr.bf16.mxu1 %v1971_v2 }
 0x200   :  { %1680 = vmatmul.mubr.msk.f32.vlgmr.msra.gmra.mrb[2].mxu1 %vm109_vm1, %v1541_v37 }
 0x201   :  { %1830 = vmatpush3.bf16.msra.mxu1 %v2017_v5  ;;  %1708 = vmatprep.mubr.msk.f32.mxu1 %vm1972_vm0, %v1973_v10 }
 0x202   :  { %1831 = vmatprep.subr.bf16.mxu1 %v1971_v2 }
 0x205   :  { %1833 = vmatpush3.bf16.msra.mxu1 %v2037_v11 }
 0x206   :  { %1834 = vmatprep.subr.bf16.mxu1 %v1971_v2 }
 0x2d3   :  { %v356_v38 = vpop.f32.mrb[2].mxu1 }
 0x2d4   :  { %v1544_v39 = vmul.f32 -1.442695, %v356_v38  ;;  %v1681_v40 = vpop.f32.mrb[3].mxu1 }
 0x2d5   :  { %v1560_v40 = vld [vmem:[%s2216_s0 + $0x28] sm:$0xff] }
 0x2d6   :  { %1910 = vpow2.f32 %v1544_v39 }
 0x2e0   :  { %v1911_v41 = vpop.eup %1910 }
 0x2e1   :  { %v363_v42 = vadd.f32 1.0, %v1911_v41 }
 0x2e3   :  { %1912 = vrcp.f32 %v363_v42 }
 0x2e4   :  { %1914 = vtanh.f32 %v356_v38 }
 0x2ed   :  { %v1913_v43 = vpop.eup %1912 }
 0x2ee   :  { %372 = vrot.lane.b32.xlu0 %v1913_v43, %s1975_s8  ;;  %368 = vrot.lane.b32.xlu1 %v1913_v43, %s1974_s1  ;;  %v1915_v45 = vpop.eup %1914 }
 0x2f2   :  { %385 = vperm.xlu0 %1901, %v1545_v44   ;;  %378 = vrot.lane.b32.xlu1 %v1913_v43, %s1976_s9 }
 0x360   :  { %v373_v46 = vpop.permute.xlu0 %372  ;;  %v369_v47 = vpop.permute.xlu1 %368 }
 0x361   :  { %v375_v48 = vmul.f32 %v373_v46, %v200_v32  ;;  %v371_v49 = vmul.f32 %v1915_v45, %v369_v47 }
 0x363   :  { %v376_v50 = vadd.f32 %v375_v48, %v371_v49 }
 0x364   :  { %v379_v52 = vpop.permute.xlu1 %378 }
 0x365   :  { %1916 = vtanh.f32 %v376_v50 }
 0x36f   :  { %v1917_v51 = vpop.eup %1916 }
 0x370   :  { %v381_v53 = vmul.f32 %v1917_v51, %v379_v52 }
 0x371   :  { %v386_v54 = vpop.permute.xlu0 %385 }
 0x372   :  { %1691 = vmatmul.mubr.msk.f32.vlgmr.msra.gmra.mrb[2].mxu0 %vm35_vm3, %v381_v53  ;;  %vm387_vm5 = vcmp.eq.s32.totalorder %v386_v54, %v2053_v14 }
 0x373   :  { %1827 = vmatpush3.bf16.msra.mxu0 %v2039_v12  ;;  %1697 = vmatprep.mubr.msk.f32.mxu0 %vm1972_vm0, %v1973_v10  ;;  %v1546_v55 = vsel %vm387_vm5, 1.0, %v1973_v10 }
 0x374   :  { %1837 = vmatprep.subr.bf16.mxu0 %v1971_v2 }
 0x37a   :  { %1698 = vmatmul.mubr.msk.f32.vlgmr.msra.gmra.mrb[2].mxu0 %vm109_vm1, %v1546_v55 }
 0x37b   :  { %1839 = vmatpush3.bf16.msra.mxu0 %v2017_v5  ;;  %1726 = vmatprep.mubr.msk.f32.mxu0 %vm1972_vm0, %v1973_v10 }
 0x37c   :  { %1840 = vmatprep.subr.bf16.mxu0 %v1971_v2 }
 0x37f   :  { %1842 = vmatpush3.bf16.msra.mxu0 %v2037_v11 }
 0x380   :  { %1843 = vmatprep.subr.bf16.mxu0 %v1971_v2 }
 0x44d   :  { %v532_v56 = vpop.f32.mrb[2].mxu0 }
 0x44e   :  { %v1549_v57 = vmul.f32 -1.442695, %v532_v56  ;;  %v1699_v58 = vpop.f32.mrb[3].mxu0 }
 0x450   :  { %1918 = vpow2.f32 %v1549_v57 }
 0x45a   :  { %v1919_v59 = vpop.eup %1918 }
 0x45b   :  { %v539_v60 = vadd.f32 1.0, %v1919_v59 }
 0x45d   :  { %1920 = vrcp.f32 %v539_v60 }
 0x45e   :  { %1922 = vtanh.f32 %v532_v56 }
 0x467   :  { %v1921_v61 = vpop.eup %1920 }
 0x468   :  { %548 = vrot.lane.b32.xlu0 %v1921_v61, %s1975_s8  ;;  %544 = vrot.lane.b32.xlu1 %v1921_v61, %s1974_s1  ;;  %v1923_v63 = vpop.eup %1922 }
 0x46c   :  { %561 = vperm.xlu0 %1901, %v1550_v62   ;;  %554 = vrot.lane.b32.xlu1 %v1921_v61, %s1976_s9 }
 0x4da   :  { %v549_v0 = vpop.permute.xlu0 %548  ;;  %v545_v1 = vpop.permute.xlu1 %544 }
 0x4db   :  { %v551_v3 = vmul.f32 %v549_v0, %v376_v50  ;;  %v547_v4 = vmul.f32 %v1923_v63, %v545_v1 }
 0x4dd   :  { %v552_v6 = vadd.f32 %v551_v3, %v547_v4 }
 0x4de   :  { %v555_v8 = vpop.permute.xlu1 %554 }
 0x4df   :  { %1924 = vtanh.f32 %v552_v6 }
 0x4e9   :  { %v1925_v7 = vpop.eup %1924 }
 0x4ea   :  { %v557_v9 = vmul.f32 %v1925_v7, %v555_v8 }
 0x4eb   :  { %v562_v13 = vpop.permute.xlu0 %561 }
 0x4ec   :  { %1709 = vmatmul.mubr.msk.f32.vlgmr.msra.gmra.mrb[4].mxu1 %vm35_vm3, %v557_v9  ;;  %vm563_vm6 = vcmp.eq.s32.totalorder %v562_v13, %v2053_v14 }
 0x4ed   :  { %1836 = vmatpush3.bf16.msra.mxu1 %v2039_v12  ;;  %1715 = vmatprep.mubr.msk.f32.mxu1 %vm1972_vm0, %v1973_v10  ;;  %v1551_v15 = vsel %vm563_vm6, 1.0, %v1973_v10 }
 0x4ee   :  { %1846 = vmatprep.subr.bf16.mxu1 %v1971_v2 }
 0x4f4   :  { %1716 = vmatmul.mubr.msk.f32.vlgmr.msra.gmra.mrb[4].mxu1 %vm109_vm1, %v1551_v15 }
 0x4f5   :  { %1848 = vmatpush3.bf16.msra.mxu1 %v2017_v5  ;;  %1744 = vmatprep.mubr.msk.f32.mxu1 %vm1972_vm0, %v1973_v10 }
 0x4f6   :  { %1849 = vmatprep.subr.bf16.mxu1 %v1971_v2 }
 0x4f9   :  { %1851 = vmatpush3.bf16.msra.mxu1 %v2037_v11 }
 0x4fa   :  { %1852 = vmatprep.subr.bf16.mxu1 %v1971_v2 }
 0x5c7   :  { %v708_v16 = vpop.f32.mrb[4].mxu1 }
 0x5c8   :  { %v1554_v17 = vmul.f32 -1.442695, %v708_v16  ;;  %v1717_v18 = vpop.f32.mrb[5].mxu1 }
 0x5ca   :  { %1926 = vpow2.f32 %v1554_v17 }
 0x5d4   :  { %v1927_v19 = vpop.eup %1926 }
 0x5d5   :  { %v715_v20 = vadd.f32 1.0, %v1927_v19 }
 0x5d7   :  { %1928 = vrcp.f32 %v715_v20 }
 0x5d8   :  { %1930 = vtanh.f32 %v708_v16  ;;  %v1570_v16 = vld [vmem:[%s2216_s0 + $0x38] sm:$0xff] }
 0x5e1   :  { %v1929_v21 = vpop.eup %1928 }
 0x5e2   :  { %724 = vrot.lane.b32.xlu0 %v1929_v21, %s1975_s8  ;;  %720 = vrot.lane.b32.xlu1 %v1929_v21, %s1974_s1  ;;  %v1931_v23 = vpop.eup %1930 }
 0x5e6   :  { %737 = vperm.xlu0 %1901, %v1555_v22   ;;  %730 = vrot.lane.b32.xlu1 %v1929_v21, %s1976_s9 }
 0x654   :  { %v725_v24 = vpop.permute.xlu0 %724  ;;  %v721_v25 = vpop.permute.xlu1 %720 }
 0x655   :  { %v727_v26 = vmul.f32 %v725_v24, %v552_v6  ;;  %v723_v27 = vmul.f32 %v1931_v23, %v721_v25 }
 0x657   :  { %v728_v28 = vadd.f32 %v727_v26, %v723_v27 }
 0x658   :  { %v731_v30 = vpop.permute.xlu1 %730 }
 0x659   :  { %1932 = vtanh.f32 %v728_v28 }
 0x663   :  { %v1933_v29 = vpop.eup %1932 }
 0x664   :  { %v733_v31 = vmul.f32 %v1933_v29, %v731_v30 }
 0x665   :  { %v738_v32 = vpop.permute.xlu0 %737 }
 0x666   :  { %1727 = vmatmul.mubr.msk.f32.vlgmr.msra.gmra.mrb[4].mxu0 %vm35_vm3, %v733_v31  ;;  %vm739_vm7 = vcmp.eq.s32.totalorder %v738_v32, %v2053_v14 }
 0x667   :  { %1845 = vmatpush3.bf16.msra.mxu0 %v2039_v12  ;;  %1733 = vmatprep.mubr.msk.f32.mxu0 %vm1972_vm0, %v1973_v10  ;;  %v1556_v33 = vsel %vm739_vm7, 1.0, %v1973_v10 }
 0x668   :  { %1855 = vmatprep.subr.bf16.mxu0 %v1971_v2 }
 0x66e   :  { %1734 = vmatmul.mubr.msk.f32.vlgmr.msra.gmra.mrb[4].mxu0 %vm109_vm1, %v1556_v33  ;;  %v1439_v33 = vld [vmem:[%s2219_s3 + $0x8] sm:$0xff] }
 0x66f   :  { %1857 = vmatpush3.bf16.msra.mxu0 %v2017_v5  ;;  %1762 = vmatprep.mubr.msk.f32.mxu0 %vm1972_vm0, %v1973_v10 }
 0x670   :  { %1858 = vmatprep.subr.bf16.mxu0 %v1971_v2 }
 0x673   :  { %1860 = vmatpush3.bf16.msra.mxu0 %v2037_v11 }
 0x674   :  { %1861 = vmatprep.subr.bf16.mxu0 %v1971_v2 }
 0x741   :  { %v884_v34 = vpop.f32.mrb[4].mxu0 }
 0x742   :  { %v1559_v35 = vmul.f32 -1.442695, %v884_v34  ;;  %v1735_v36 = vpop.f32.mrb[5].mxu0 }
 0x744   :  { %1934 = vpow2.f32 %v1559_v35 }
 0x74e   :  { %v1935_v37 = vpop.eup %1934 }
 0x74f   :  { %v891_v38 = vadd.f32 1.0, %v1935_v37 }
 0x751   :  { %1936 = vrcp.f32 %v891_v38 }
 0x752   :  { %1938 = vtanh.f32 %v884_v34  ;;  %v1441_v34 = vld [vmem:[%s2219_s3 + $0x18] sm:$0xff] }
 0x75b   :  { %v1937_v39 = vpop.eup %1936 }
 0x75c   :  { %900 = vrot.lane.b32.xlu0 %v1937_v39, %s1975_s8  ;;  %896 = vrot.lane.b32.xlu1 %v1937_v39, %s1974_s1  ;;  %v1939_v41 = vpop.eup %1938 }
 0x760   :  { %913 = vperm.xlu0 %1901, %v1560_v40   ;;  %906 = vrot.lane.b32.xlu1 %v1937_v39, %s1976_s9 }
 0x7ce   :  { %v901_v42 = vpop.permute.xlu0 %900  ;;  %v897_v43 = vpop.permute.xlu1 %896 }
 0x7cf   :  { %v903_v44 = vmul.f32 %v901_v42, %v728_v28  ;;  %v899_v45 = vmul.f32 %v1939_v41, %v897_v43 }
 0x7d1   :  { %v904_v46 = vadd.f32 %v903_v44, %v899_v45  ;;  %v1575_v45 = vld [vmem:[%s2220_s4] ss:$0 sm:$0xff] }
 0x7d2   :  { %v907_v48 = vpop.permute.xlu1 %906 }
 0x7d3   :  { %1940 = vtanh.f32 %v904_v46 }
 0x7dd   :  { %v1941_v47 = vpop.eup %1940 }
 0x7de   :  { %v909_v49 = vmul.f32 %v1941_v47, %v907_v48 }
 0x7df   :  { %v914_v50 = vpop.permute.xlu0 %913 }
 0x7e0   :  { %1745 = vmatmul.mubr.msk.f32.vlgmr.msra.gmra.mrb[6].mxu1 %vm35_vm3, %v909_v49  ;;  %vm915_vm8 = vcmp.eq.s32.totalorder %v914_v50, %v2053_v14 }
 0x7e1   :  { %1854 = vmatpush3.bf16.msra.mxu1 %v2039_v12  ;;  %1751 = vmatprep.mubr.msk.f32.mxu1 %vm1972_vm0, %v1973_v10  ;;  %v1561_v51 = vsel %vm915_vm8, 1.0, %v1973_v10 }
 0x7e2   :  { %1864 = vmatprep.subr.bf16.mxu1 %v1971_v2 }
 0x7e8   :  { %1752 = vmatmul.mubr.msk.f32.vlgmr.msra.gmra.mrb[6].mxu1 %vm109_vm1, %v1561_v51 }
 0x7e9   :  { %1866 = vmatpush3.bf16.msra.mxu1 %v2017_v5  ;;  %1780 = vmatprep.mubr.msk.f32.mxu1 %vm1972_vm0, %v1973_v10  ;;  %v1565_v5 = vld [vmem:[%s2216_s0 + $0x30] sm:$0xff] }
 0x7ea   :  { %1867 = vmatprep.subr.bf16.mxu1 %v1971_v2 }
 0x7ed   :  { %1869 = vmatpush3.bf16.msra.mxu1 %v2037_v11 }
 0x7ee   :  { %1870 = vmatprep.subr.bf16.mxu1 %v1971_v2 }
 0x8bb   :  { %v1060_v52 = vpop.f32.mrb[6].mxu1 }
 0x8bc   :  { %v1564_v53 = vmul.f32 -1.442695, %v1060_v52  ;;  %v1753_v54 = vpop.f32.mrb[7].mxu1 }
 0x8be   :  { %1942 = vpow2.f32 %v1564_v53 }
 0x8c8   :  { %v1943_v55 = vpop.eup %1942 }
 0x8c9   :  { %v1067_v56 = vadd.f32 1.0, %v1943_v55 }
 0x8cb   :  { %1944 = vrcp.f32 %v1067_v56 }
 0x8cc   :  { %1946 = vtanh.f32 %v1060_v52 }
 0x8d5   :  { %v1945_v57 = vpop.eup %1944 }
 0x8d6   :  { %1076 = vrot.lane.b32.xlu0 %v1945_v57, %s1975_s8  ;;  %1072 = vrot.lane.b32.xlu1 %v1945_v57, %s1974_s1  ;;  %v1947_v11 = vpop.eup %1946 }
 0x8da   :  { %1089 = vperm.xlu0 %1901, %v1565_v5   ;;  %1082 = vrot.lane.b32.xlu1 %v1945_v57, %s1976_s9 }
 0x948   :  { %v1077_v58 = vpop.permute.xlu0 %1076  ;;  %v1073_v59 = vpop.permute.xlu1 %1072 }
 0x949   :  { %v1079_v60 = vmul.f32 %v1077_v58, %v904_v46  ;;  %v1075_v61 = vmul.f32 %v1947_v11, %v1073_v59 }
 0x94b   :  { %v1080_v62 = vadd.f32 %v1079_v60, %v1075_v61 }
 0x94c   :  { %v1083_v0 = vpop.permute.xlu1 %1082 }
 0x94d   :  { %1948 = vtanh.f32 %v1080_v62 }
 0x957   :  { %v1949_v63 = vpop.eup %1948 }
 0x958   :  { %v1085_v1 = vmul.f32 %v1949_v63, %v1083_v0 }
 0x959   :  { %v1090_v3 = vpop.permute.xlu0 %1089 }
 0x95a   :  { %1763 = vmatmul.mubr.msk.f32.vlgmr.msra.gmra.mrb[6].mxu0 %vm35_vm3, %v1085_v1  ;;  %vm1091_vm9 = vcmp.eq.s32.totalorder %v1090_v3, %v2053_v14 }
 0x95b   :  { %1863 = vmatpush3.bf16.msra.mxu0 %v2039_v12  ;;  %1769 = vmatprep.mubr.msk.f32.mxu0 %vm1972_vm0, %v1973_v10  ;;  %v1566_v4 = vsel %vm1091_vm9, 1.0, %v1973_v10 }
 0x95c   :  { %1873 = vmatprep.subr.bf16.mxu0 %v1971_v2 }
 0x962   :  { %1770 = vmatmul.mubr.msk.f32.vlgmr.msra.gmra.mrb[6].mxu0 %vm109_vm1, %v1566_v4 }
 0x963   :  { %1798 = vmatprep.mubr.msk.f32.mxu0 %vm1972_vm0, %v1973_v10 }
 0xa35   :  { %v1236_v6 = vpop.f32.mrb[6].mxu0 }
 0xa36   :  { %v1569_v7 = vmul.f32 -1.442695, %v1236_v6  ;;  %v1771_v8 = vpop.f32.mrb[7].mxu0 }
 0xa38   :  { %1950 = vpow2.f32 %v1569_v7 }
 0xa42   :  { %v1951_v9 = vpop.eup %1950 }
 0xa43   :  { %v1243_v13 = vadd.f32 1.0, %v1951_v9 }
 0xa45   :  { %1952 = vrcp.f32 %v1243_v13 }
 0xa46   :  { %1954 = vtanh.f32 %v1236_v6 }
 0xa4f   :  { %v1953_v15 = vpop.eup %1952 }
 0xa50   :  { %1252 = vrot.lane.b32.xlu0 %v1953_v15, %s1975_s8  ;;  %1248 = vrot.lane.b32.xlu1 %v1953_v15, %s1974_s1  ;;  %v1955_v17 = vpop.eup %1954 }
 0xa54   :  { %1265 = vperm.xlu0 %1901, %v1570_v16   ;;  %1258 = vrot.lane.b32.xlu1 %v1953_v15, %s1976_s9 }
 0xac2   :  { %v1253_v18 = vpop.permute.xlu0 %1252  ;;  %v1249_v19 = vpop.permute.xlu1 %1248 }
 0xac3   :  { %v1255_v20 = vmul.f32 %v1253_v18, %v1080_v62  ;;  %v1251_v21 = vmul.f32 %v1955_v17, %v1249_v19 }
 0xac5   :  { %v1256_v22 = vadd.f32 %v1255_v20, %v1251_v21 }
 0xac6   :  { %v1259_v24 = vpop.permute.xlu1 %1258 }
 0xac7   :  { %1956 = vtanh.f32 %v1256_v22 }
 0xad1   :  { %v1957_v23 = vpop.eup %1956 }
 0xad2   :  { %v1261_v25 = vmul.f32 %v1957_v23, %v1259_v24 }
 0xad3   :  { %v1266_v26 = vpop.permute.xlu0 %1265 }
 0xad4   :  { %1781 = vmatmul.mubr.msk.f32.vlgmr.msra.gmra.mrb[8].mxu1 %vm35_vm3, %v1261_v25  ;;  %vm1267_vm10 = vcmp.eq.s32.totalorder %v1266_v26, %v2053_v14 }
 0xad5   :  { %1872 = vmatpush3.bf16.msra.mxu1 %v2039_v12  ;;  %1787 = vmatprep.mubr.msk.f32.mxu1 %vm1972_vm0, %v1973_v10  ;;  %v1571_v27 = vsel %vm1267_vm10, 1.0, %v1973_v10  ;;  %v1438_v12 = vld [vmem:[%s2219_s3] sm:$0xff]  ;;  %v1440_v10 = vld [vmem:[%s2219_s3 + $0x10] sm:$0xff] }
 0xad6   :  { %v1874_v14 = vpack.c.bf16 %v1439_v33, %v1438_v12  ;;  %v1877_v36 = vpack.c.bf16 %v1441_v34, %v1440_v10 }
 0xad8   :  { %1875 = vmatpush3.bf16.msra.mxu0 %v1874_v14 }
 0xad9   :  { %1876 = vmatprep.subr.bf16.mxu0 %v1971_v2 }
 0xadc   :  { %1788 = vmatmul.mubr.msk.f32.vlgmr.msra.gmra.mrb[8].mxu1 %vm109_vm1, %v1571_v27  ;;  %1878 = vmatpush3.bf16.msra.mxu0 %v1877_v36 }
 0xbaf   :  { %v1412_v28 = vpop.f32.mrb[8].mxu1 }
 0xbb0   :  { %v1574_v29 = vmul.f32 -1.442695, %v1412_v28  ;;  %v1789_v30 = vpop.f32.mrb[9].mxu1 }
 0xbb2   :  { %1958 = vpow2.f32 %v1574_v29 }
 0xbbc   :  { %v1959_v31 = vpop.eup %1958 }
 0xbbd   :  { %v1419_v32 = vadd.f32 1.0, %v1959_v31 }
 0xbbf   :  { %1960 = vrcp.f32 %v1419_v32 }
 0xbc0   :  { %1962 = vtanh.f32 %v1412_v28 }
 0xbc9   :  { %v1961_v35 = vpop.eup %1960 }
 0xbca   :  { %1428 = vrot.lane.b32.xlu0 %v1961_v35, %s1975_s8  ;;  %1424 = vrot.lane.b32.xlu1 %v1961_v35, %s1974_s1  ;;  %v1963_v37 = vpop.eup %1962 }
 0xbce   :  { %1434 = vrot.lane.b32.xlu1 %v1961_v35, %s1976_s9 }
 0xc3c   :  { %v1429_v2 = vpop.permute.xlu0 %1428  ;;  %v1425_v38 = vpop.permute.xlu1 %1424 }
 0xc3d   :  { %v1431_v39 = vmul.f32 %v1429_v2, %v1256_v22  ;;  %v1427_v40 = vmul.f32 %v1963_v37, %v1425_v38 }
 0xc3f   :  { %v1432_v41 = vadd.f32 %v1431_v39, %v1427_v40 }
 0xc40   :  { %v1435_v43 = vpop.permute.xlu1 %1434 }
 0xc41   :  { %1964 = vtanh.f32 %v1432_v41 }
 0xc4b   :  { %v1965_v42 = vpop.eup %1964 }
 0xc4c   :  { %v1437_v44 = vmul.f32 %v1965_v42, %v1435_v43 }
 0xc4e   :  { %1799 = vmatmul.mubr.msk.f32.vlgmr.msra.gmra.mrb[8].mxu0 %vm35_vm3, %v1437_v44 }
 0xd21   :  { %v1518_v46 = vpop.f32.mrb[8].mxu0 }
 0xd22   :  { %v1519_v47 = vadd.f32 %v1575_v45, %v1518_v46  ;;  %v1800_v48 = vpop.f32.mrb[9].mxu0 }
 0xd24   :  { %1522 = vmax.xlane.f32.xlu0 %v1519_v47 }
 0xdb1   :  { %v1523_v49 = vpop.xlane.xlu0 %1522 }
 0xdb2   :  { %v1524_v50 = vsub.f32 %v1519_v47, %v1523_v49 }
 0xdb4   :  { %v1525_v51 = vmul.f32 1.442695, %v1524_v50 }
 0xdb6   :  { %1966 = vpow2.f32 %v1525_v51 }
 0xdc0   :  { %v1967_v52 = vpop.eup %1966 }
 0xdc1   :  { %1527 = vadd.xlane.f32.xlu1 %v1967_v52 }
 0xe4e   :  { %v1528_v53 = vpop.xlane.xlu1 %1527 }
 0xe4f   :  { %1968 = vlog2.f32 %v1528_v53 }
 0xe59   :  { %v1969_v54 = vpop.eup %1968 }
 0xe5a   :  { %v1530_v55 = vmul.f32 0.6931472, %v1969_v54 }
 0xe5c   :  { %v1531_v56 = vsub.f32 %v1524_v50, %v1530_v55 }
 0xe5e   :  { %1532 = vst [vmem:[%s2221_s5] sm:$0xff] %v1531_v56 }

</bundles_post_ra>
